<compile_context>
chip_gen: v7x
topology: tpu7x:2x2x1
jax: 0.10.0
libtpu: 0.0.40
codegen_flags: <defaults>
</compile_context>

<pallas_src>
import functools

import jax
import jax.numpy as jnp
import numpy as np
from jax.experimental import pallas as pl
from jax.experimental.pallas import tpu as pltpu

LANE = 128  # per-gate / hidden / output lane padding (one full vreg lane tile)


# -----------------------------------------------------------------------------
# Kernel
# -----------------------------------------------------------------------------
def _gru_seq_kernel(x_ref, h0_ref, gru_ref, head_ref, out_ref, h_scr, *,
                    input_size):
    """One GRUCell + Linear step per grid iteration; h carried in VMEM scratch.

    gru_ref  : (I + HP + 2, 3*GP) slab = [W_ih^T ; W_hh^T ; b_ih ; b_hh]
    head_ref : (HP + 1, OP) slab       = [W_out^T ; b_out]
    out_ref  : (1, B, 2*LANE) block    = [h_next_pad | q_pad]
    """
    I = input_size
    HP = LANE
    GP = LANE

    t = pl.program_id(0)

    @pl.when(t == 0)
    def _():
        h_scr[...] = h0_ref[...]

    x = x_ref[0]                                  # (B, I)   f32
    h = h_scr[...]                                # (B, HP)  f32

    # Parameter views (static, sublane-aligned slices of the resident slab).
    w_ih = gru_ref[0:I, :]                        # (I,  3*GP)
    w_hh = gru_ref[I:I + HP, :]                   # (HP, 3*GP)
    b_ih = gru_ref[I + HP:I + HP + 1, :]          # (1,  3*GP)
    b_hh = gru_ref[I + HP + 1:I + HP + 2, :]      # (1,  3*GP)

    # GRUCell: gi = x @ W_ih^T + b_ih ; gh = h @ W_hh^T + b_hh   (f32 MXU acc)
    gi = jnp.dot(x, w_ih, preferred_element_type=jnp.float32) + b_ih
    gh = jnp.dot(h, w_hh, preferred_element_type=jnp.float32) + b_hh

    # PyTorch gate order (r, z, n); each gate sits in its own 128-lane block,
    # so these slices are lane-tile aligned (no cross-lane shuffles).
    i_r, i_z, i_n = gi[:, 0:GP], gi[:, GP:2 * GP], gi[:, 2 * GP:3 * GP]
    h_r, h_z, h_n = gh[:, 0:GP], gh[:, GP:2 * GP], gh[:, 2 * GP:3 * GP]

    r = jax.nn.sigmoid(i_r + h_r)
    z = jax.nn.sigmoid(i_z + h_z)
    n = jnp.tanh(i_n + r * h_n)
    h_next = (1.0 - z) * n + z * h                # padded lanes stay exactly 0

    h_scr[...] = h_next                            # carry to next grid step

    # Linear head: q = h_next @ W_out^T + b_out
    w_out = head_ref[0:HP, :]                      # (HP, OP)
    b_out = head_ref[HP:HP + 1, :]                 # (1,  OP)
    q = jnp.dot(h_next, w_out, preferred_element_type=jnp.float32) + b_out

    # Lane-dense packed output: [h_next_pad | q_pad] -> one 256-lane row slab.
    out_ref[0, :, 0:LANE] = h_next.astype(out_ref.dtype)
    out_ref[0, :, LANE:2 * LANE] = q.astype(out_ref.dtype)


# -----------------------------------------------------------------------------
# Host-side packing + wrappers
# -----------------------------------------------------------------------------
def pack_params(params, input_size, hidden_size, output_size):
    """Pack the 6 parameter tensors into two 128-lane-padded VMEM slabs."""
    I, H, O = input_size, hidden_size, output_size
    HP = GP = OP = LANE

    def pad_gates(w):  # (rows, 3H) -> (rows, 3*GP), gate g in lanes [g*GP, g*GP+H)
        rows = w.shape[0]
        out = jnp.zeros((rows, 3 * GP), jnp.float32)
        for g in range(3):
            out = out.at[:, g * GP:g * GP + H].set(w[:, g * H:(g + 1) * H])
        return out

    w_ih_p = pad_gates(params["w_ih_t"])                                  # (I, 3GP)
    w_hh_p = jnp.zeros((HP, 3 * GP), jnp.float32).at[:H].set(
        pad_gates(params["w_hh_t"]))                                      # (HP, 3GP)
    b_ih_p = pad_gates(params["b_ih"])                                    # (1, 3GP)
    b_hh_p = pad_gates(params["b_hh"])                                    # (1, 3GP)
    gru_slab = jnp.concatenate([w_ih_p, w_hh_p, b_ih_p, b_hh_p], axis=0)  # (I+HP+2, 3GP)

    w_out_p = jnp.zeros((HP, OP), jnp.float32).at[:H, :O].set(params["w_out_t"])
    b_out_p = jnp.zeros((1, OP), jnp.float32).at[:, :O].set(params["b_out"])
    head_slab = jnp.concatenate([w_out_p, b_out_p], axis=0)               # (HP+1, OP)
    return gru_slab, head_slab


def sarsa_rnn_scan(xs, h0, params):
    """Apply SarsaRNN.forward over a sequence in ONE pallas_call.

    xs: (T, B, I), h0: (B, H)  ->  (qs (T, B, O), hs (T, B, H))
    """
    T, B, I = xs.shape
    H = h0.shape[-1]
    O = params["w_out_t"].shape[-1]
    HP = LANE

    gru_slab, head_slab = pack_params(params, I, H, O)
    h0_pad = jnp.zeros((B, HP), jnp.float32).at[:, :H].set(h0.astype(jnp.float32))
    xs = xs.astype(jnp.float32)

    kernel = functools.partial(_gru_seq_kernel, input_size=I)

    out = pl.pallas_call(
        kernel,
        out_shape=jax.ShapeDtypeStruct((T, B, 2 * LANE), jnp.float32),
        grid_spec=pltpu.PrefetchScalarGridSpec(
            num_scalar_prefetch=0,
            grid=(T,),
            in_specs=[
                # per-step input slice
                pl.BlockSpec((1, B, I), lambda t: (t, 0, 0)),
                # resident (constant block index -> fetched once) operands
                pl.BlockSpec((B, HP), lambda t: (0, 0)),
                pl.BlockSpec(gru_slab.shape, lambda t: (0, 0)),
                pl.BlockSpec(head_slab.shape, lambda t: (0, 0)),
            ],
            out_specs=pl.BlockSpec((1, B, 2 * LANE), lambda t: (t, 0, 0)),
            scratch_shapes=[pltpu.VMEM((B, HP), jnp.float32)],
        ),
        compiler_params=pltpu.CompilerParams(
            # time axis is a recurrence: must be sequential
            dimension_semantics=("arbitrary",)),
    )(xs, h0_pad, gru_slab, head_slab)

    hs = out[:, :, :H]                  # (T, B, H)
    qs = out[:, :, LANE:LANE + O]       # (T, B, O)
    return qs, hs


def sarsa_rnn_forward(x, h_prev, params):
    """Pallas equivalent of SarsaRNN.forward(x, h_prev) -> (q, h_next)."""
    qs, hs = sarsa_rnn_scan(x[None], h_prev, params)
    return qs[0], hs[0]


# -----------------------------------------------------------------------------
# Init + reference
# -----------------------------------------------------------------------------
def init_params(key, input_size, hidden_size, output_size):
    """Deterministic init mirroring PyTorch GRUCell/Linear uniform(-k, k)."""
    ks = jax.random.split(key, 6)
    k_gru = 1.0 / np.sqrt(hidden_size)
    k_lin = 1.0 / np.sqrt(hidden_size)
    u = lambda k, shape, bound: jax.random.uniform(
        k, shape, jnp.float32, minval=-bound, maxval=bound)
    return {
        # stored already transposed for the kernel matmuls (gate order r,z,n)
        "w_ih_t": u(ks[0], (input_size, 3 * hidden_size), k_gru),
        "w_hh_t": u(ks[1], (hidden_size, 3 * hidden_size), k_gru),
        "b_ih":   u(ks[2], (1, 3 * hidden_size), k_gru),
        "b_hh":   u(ks[3], (1, 3 * hidden_size), k_gru),
        "w_out_t": u(ks[4], (hidden_size, output_size), k_lin),
        "b_out":   u(ks[5], (1, output_size), k_lin),
    }


def _reference_forward(x, h, p):
    """Pure-JAX reference (semantics of nn.GRUCell + nn.Linear)."""
    H = h.shape[-1]
    gi = x @ p["w_ih_t"] + p["b_ih"]
    gh = h @ p["w_hh_t"] + p["b_hh"]
    r = jax.nn.sigmoid(gi[:, :H] + gh[:, :H])
    z = jax.nn.sigmoid(gi[:, H:2 * H] + gh[:, H:2 * H])
    n = jnp.tanh(gi[:, 2 * H:] + r * gh[:, 2 * H:])
    h_next = (1.0 - z) * n + z * h
    return h_next @ p["w_out_t"] + p["b_out"], h_next


# -----------------------------------------------------------------------------
# Self-test
# -----------------------------------------------------------------------------
if __name__ == "__main__":
    T, B, I, H, O = 8, 2, 8, 32, 4   # seq=8, batch=2, input=8, hidden=32, out=4

    key = jax.random.PRNGKey(0)
    k_p, k_x, k_h = jax.random.split(key, 3)
    params = init_params(k_p, I, H, O)
    xs = jax.random.normal(k_x, (T, B, I), jnp.float32)
    h0 = jax.random.normal(k_h, (B, H), jnp.float32)

    # Full-sequence kernel (the recurrence lives inside one pallas_call).
    qs, hs = sarsa_rnn_scan(xs, h0, params)
    jax.block_until_ready((qs, hs))

    def _ref_step(h, x):
        q, h2 = _reference_forward(x, h, params)
        return h2, (q, h2)
    _, (q_ref_seq, h_ref_seq) = jax.lax.scan(_ref_step, h0, xs)
    np.testing.assert_allclose(np.asarray(qs), np.asarray(q_ref_seq),
                               rtol=1e-5, atol=1e-5)
    np.testing.assert_allclose(np.asarray(hs), np.asarray(h_ref_seq),
                               rtol=1e-5, atol=1e-5)

    # Single-step forward (exact SarsaRNN.forward signature).
    q1, h1 = sarsa_rnn_forward(xs[0], h0, params)
    jax.block_until_ready((q1, h1))
    q1_ref, h1_ref = _reference_forward(xs[0], h0, params)
    np.testing.assert_allclose(np.asarray(q1), np.asarray(q1_ref),
                               rtol=1e-5, atol=1e-5)
    np.testing.assert_allclose(np.asarray(h1), np.asarray(h1_ref),
                               rtol=1e-5, atol=1e-5)

    # TODO(synk): sample_action / predict / Q use host-side numpy RNG
    # (epsilon-greedy / softmax sampling) and python control flow; only the
    # forward() compute (GRUCell + Linear) is implemented as a Pallas kernel.
    print("KERNEL_OK")
</pallas_src>

<mosaic_0001>
module attributes {stable_mosaic.version = 11 : i64} {
  func.func @_gru_seq_kernel(%arg0: i32, %arg1: memref<1x2x8xf32, #tpu.memory_space<vmem>>, %arg2: memref<2x128xf32, #tpu.memory_space<vmem>>, %arg3: memref<138x384xf32, #tpu.memory_space<vmem>>, %arg4: memref<129x128xf32, #tpu.memory_space<vmem>>, %arg5: memref<1x2x256xf32, #tpu.memory_space<vmem>>, %arg6: memref<2x128xf32, #tpu.memory_space<vmem>>) attributes {dimension_semantics = [#tpu.dimension_semantics<arbitrary>], iteration_bounds = array<i64: 8>, scalar_prefetch = 0 : i64, scratch_operands = 1 : i64, tpu.core_type = #tpu.core_type<tc>, window_params = [{transform_indices = @transform_0, window_bounds = array<i64: 1, 2, 8>}, {pipeline_mode = #tpu.pipeline_mode<synchronous>, transform_indices = @transform_1, window_bounds = array<i64: 2, 128>}, {pipeline_mode = #tpu.pipeline_mode<synchronous>, transform_indices = @transform_2, window_bounds = array<i64: 138, 384>}, {pipeline_mode = #tpu.pipeline_mode<synchronous>, transform_indices = @transform_3, window_bounds = array<i64: 129, 128>}, {transform_indices = @transform_4, window_bounds = array<i64: 1, 2, 256>}]} {
    %c0_i32 = arith.constant 0 : i32
    %0 = arith.cmpi eq, %arg0, %c0_i32 : i32
    %1 = arith.extui %0 : i1 to i32
    %c0_i32_0 = arith.constant 0 : i32
    %2 = arith.cmpi ne, %1, %c0_i32_0 : i32
    scf.if %2 {
      %c0_26 = arith.constant 0 : index
      %c0_27 = arith.constant 0 : index
      %54 = vector.load %arg2[%c0_26, %c0_27] : memref<2x128xf32, #tpu.memory_space<vmem>>, vector<2x128xf32>
      %c0_28 = arith.constant 0 : index
      %c0_29 = arith.constant 0 : index
      %55 = vector.load %arg6[%c0_28, %c0_29] : memref<2x128xf32, #tpu.memory_space<vmem>>, vector<2x128xf32>
      tpu.vector_store %arg6[%c0_28, %c0_29], %54 {strides = array<i32>} : memref<2x128xf32, #tpu.memory_space<vmem>>, vector<2x128xf32>,
    } else {
    }
    %c0 = arith.constant 0 : index
    %c0_1 = arith.constant 0 : index
    %c0_2 = arith.constant 0 : index
    %3 = vector.load %arg1[%c0, %c0_1, %c0_2] : memref<1x2x8xf32, #tpu.memory_space<vmem>>, vector<1x2x8xf32>
    %4 = vector.shape_cast %3 : vector<1x2x8xf32> to vector<2x8xf32>
    %c0_3 = arith.constant 0 : index
    %c0_4 = arith.constant 0 : index
    %5 = vector.load %arg6[%c0_3, %c0_4] : memref<2x128xf32, #tpu.memory_space<vmem>>, vector<2x128xf32>
    %c0_5 = arith.constant 0 : index
    %c0_6 = arith.constant 0 : index
    %6 = vector.load %arg3[%c0_5, %c0_6] : memref<138x384xf32, #tpu.memory_space<vmem>>, vector<8x384xf32>
    %c8 = arith.constant 8 : index
    %c0_7 = arith.constant 0 : index
    %7 = vector.load %arg3[%c8, %c0_7] : memref<138x384xf32, #tpu.memory_space<vmem>>, vector<128x384xf32>
    %c136 = arith.constant 136 : index
    %c0_8 = arith.constant 0 : index
    %8 = vector.load %arg3[%c136, %c0_8] : memref<138x384xf32, #tpu.memory_space<vmem>>, vector<1x384xf32>
    %c137 = arith.constant 137 : index
    %c0_9 = arith.constant 0 : index
    %9 = vector.load %arg3[%c137, %c0_9] : memref<138x384xf32, #tpu.memory_space<vmem>>, vector<1x384xf32>
    %cst = arith.constant dense<0.000000e+00> : vector<2x384xf32>
    %10 = tpu.matmul %4, %6, %cst {dimension_numbers = #tpu.dot_dimension_numbers<[1], [0], [0], [1], [0, 0, 1, 1], [], []>} : vector<2x8xf32>, vector<8x384xf32>, vector<2x384xf32> -> vector<2x384xf32>
    %11 = vector.broadcast %8 : vector<1x384xf32> to vector<2x384xf32>
    %12 = arith.addf %10, %11 : vector<2x384xf32>
    %cst_10 = arith.constant dense<0.000000e+00> : vector<2x384xf32>
    %13 = tpu.matmul %5, %7, %cst_10 {dimension_numbers = #tpu.dot_dimension_numbers<[1], [0], [0], [1], [0, 0, 1, 1], [], []>} : vector<2x128xf32>, vector<128x384xf32>, vector<2x384xf32> -> vector<2x384xf32>
    %14 = vector.broadcast %9 : vector<1x384xf32> to vector<2x384xf32>
    %15 = arith.addf %13, %14 : vector<2x384xf32>
    %16 = vector.extract_strided_slice %12 {offsets = [0, 0], sizes = [2, 128], strides = [1, 1]} : vector<2x384xf32> to vector<2x128xf32>
    %17 = vector.extract_strided_slice %12 {offsets = [0, 128], sizes = [2, 128], strides = [1, 1]} : vector<2x384xf32> to vector<2x128xf32>
    %18 = vector.extract_strided_slice %12 {offsets = [0, 256], sizes = [2, 128], strides = [1, 1]} : vector<2x384xf32> to vector<2x128xf32>
    %19 = vector.extract_strided_slice %15 {offsets = [0, 0], sizes = [2, 128], strides = [1, 1]} : vector<2x384xf32> to vector<2x128xf32>
    %20 = vector.extract_strided_slice %15 {offsets = [0, 128], sizes = [2, 128], strides = [1, 1]} : vector<2x384xf32> to vector<2x128xf32>
    %21 = vector.extract_strided_slice %15 {offsets = [0, 256], sizes = [2, 128], strides = [1, 1]} : vector<2x384xf32> to vector<2x128xf32>
    %22 = arith.addf %16, %19 : vector<2x128xf32>
    %23 = arith.negf %22 : vector<2x128xf32>
    %24 = math.exp %23 : vector<2x128xf32>
    %cst_11 = arith.constant 1.000000e+00 : f32
    %25 = vector.broadcast %cst_11 : f32 to vector<2x128xf32>
    %26 = arith.addf %25, %24 : vector<2x128xf32>
    %27 = arith.divf %25, %26 : vector<2x128xf32>
    %28 = arith.addf %17, %20 : vector<2x128xf32>
    %29 = arith.negf %28 : vector<2x128xf32>
    %30 = math.exp %29 : vector<2x128xf32>
    %cst_12 = arith.constant 1.000000e+00 : f32
    %31 = vector.broadcast %cst_12 : f32 to vector<2x128xf32>
    %32 = arith.addf %31, %30 : vector<2x128xf32>
    %33 = arith.divf %31, %32 : vector<2x128xf32>
    %34 = arith.mulf %27, %21 : vector<2x128xf32>
    %35 = arith.addf %18, %34 : vector<2x128xf32>
    %36 = math.tanh %35 : vector<2x128xf32>
    %cst_13 = arith.constant 1.000000e+00 : f32
    %37 = vector.broadcast %cst_13 : f32 to vector<2x128xf32>
    %38 = arith.subf %37, %33 : vector<2x128xf32>
    %39 = arith.mulf %38, %36 : vector<2x128xf32>
    %40 = arith.mulf %33, %5 : vector<2x128xf32>
    %41 = arith.addf %39, %40 : vector<2x128xf32>
    %c0_14 = arith.constant 0 : index
    %c0_15 = arith.constant 0 : index
    %42 = vector.load %arg6[%c0_14, %c0_15] : memref<2x128xf32, #tpu.memory_space<vmem>>, vector<2x128xf32>
    tpu.vector_store %arg6[%c0_14, %c0_15], %41 {strides = array<i32>} : memref<2x128xf32, #tpu.memory_space<vmem>>, vector<2x128xf32>,
    %c0_16 = arith.constant 0 : index
    %c0_17 = arith.constant 0 : index
    %43 = vector.load %arg4[%c0_16, %c0_17] : memref<129x128xf32, #tpu.memory_space<vmem>>, vector<128x128xf32>
    %c128 = arith.constant 128 : index
    %c0_18 = arith.constant 0 : index
    %44 = vector.load %arg4[%c128, %c0_18] : memref<129x128xf32, #tpu.memory_space<vmem>>, vector<1x128xf32>
    %cst_19 = arith.constant dense<0.000000e+00> : vector<2x128xf32>
    %45 = tpu.matmul %41, %43, %cst_19 {dimension_numbers = #tpu.dot_dimension_numbers<[1], [0], [0], [1], [0, 0, 1, 1], [], []>} : vector<2x128xf32>, vector<128x128xf32>, vector<2x128xf32> -> vector<2x128xf32>
    %46 = vector.broadcast %44 : vector<1x128xf32> to vector<2x128xf32>
    %47 = arith.addf %45, %46 : vector<2x128xf32>
    %c0_20 = arith.constant 0 : index
    %c0_21 = arith.constant 0 : index
    %c0_22 = arith.constant 0 : index
    %48 = vector.load %arg5[%c0_20, %c0_21, %c0_22] : memref<1x2x256xf32, #tpu.memory_space<vmem>>, vector<1x2x128xf32>
    %49 = vector.shape_cast %48 : vector<1x2x128xf32> to vector<2x128xf32>
    %50 = vector.shape_cast %41 : vector<2x128xf32> to vector<1x2x128xf32>
    tpu.vector_store %arg5[%c0_20, %c0_21, %c0_22], %50 {strides = array<i32>} : memref<1x2x256xf32, #tpu.memory_space<vmem>>, vector<1x2x128xf32>,
    %c0_23 = arith.constant 0 : index
    %c0_24 = arith.constant 0 : index
    %c128_25 = arith.constant 128 : index
    %51 = vector.load %arg5[%c0_23, %c0_24, %c128_25] : memref<1x2x256xf32, #tpu.memory_space<vmem>>, vector<1x2x128xf32>
    %52 = vector.shape_cast %51 : vector<1x2x128xf32> to vector<2x128xf32>
    %53 = vector.shape_cast %47 : vector<2x128xf32> to vector<1x2x128xf32>
    tpu.vector_store %arg5[%c0_23, %c0_24, %c128_25], %53 {strides = array<i32>} : memref<1x2x256xf32, #tpu.memory_space<vmem>>, vector<1x2x128xf32>,
    return
  }
  func.func @transform_0(%arg0: i32) -> (i32, i32, i32) {
    %c0_i32 = arith.constant 0 : i32
    %c0_i32_0 = arith.constant 0 : i32
    %c0_i32_1 = arith.constant 0 : i32
    return %arg0, %c0_i32, %c0_i32_0 : i32, i32, i32
  }
  func.func @transform_1(%arg0: i32) -> (i32, i32) {
    %c0_i32 = arith.constant 0 : i32
    %c0_i32_0 = arith.constant 0 : i32
    %c0_i32_1 = arith.constant 0 : i32
    return %c0_i32, %c0_i32_0 : i32, i32
  }
  func.func @transform_2(%arg0: i32) -> (i32, i32) {
    %c0_i32 = arith.constant 0 : i32
    %c0_i32_0 = arith.constant 0 : i32
    %c0_i32_1 = arith.constant 0 : i32
    return %c0_i32, %c0_i32_0 : i32, i32
  }
  func.func @transform_3(%arg0: i32) -> (i32, i32) {
    %c0_i32 = arith.constant 0 : i32
    %c0_i32_0 = arith.constant 0 : i32
    %c0_i32_1 = arith.constant 0 : i32
    return %c0_i32, %c0_i32_0 : i32, i32
  }
  func.func @transform_4(%arg0: i32) -> (i32, i32, i32) {
    %c0_i32 = arith.constant 0 : i32
    %c0_i32_0 = arith.constant 0 : i32
    %c0_i32_1 = arith.constant 0 : i32
    return %arg0, %c0_i32, %c0_i32_0 : i32, i32, i32
  }
}

</mosaic_0001>

<bundles_post_ra>
// kernel: tpu_custom_call.1
= control target key start
LH: loop header
LB: loop body
LE: loop exit
PB: predicated region body
PF: predicated region fallthrough
CT: control target
= control target key end

     0   :  { %9 = vsyncpa [#allocation4], 0  ;;  %s1608_s0 = inlined_call_operand.hbm [shape: f32[8,2,8], index: 0, kind: input, shape index: {}]   ;;  %s1609_s1 = inlined_call_operand.vmem [shape: f32[2,128], index: 1, kind: input, shape index: {}]   ;;  %s1610_s2 = inlined_call_operand.hbm [shape: f32[138,384], index: 2, kind: input, shape index: {}]   ;;  %s1611_s3 = inlined_call_operand.hbm [shape: f32[129,128], index: 3, kind: input, shape index: {}]   ;;  %s1612_s4 = inlined_call_operand.hbm [shape: f32[8,2,256], index: 4, kind: output, shape index: {}]  }
   0x1   :  { %11 = vsyncpa [#allocation4 + $0x1], 0 }
   0x2   :  { %12 = vsyncpa [#allocation7], 0 }
   0x3   :  { %13 = vsyncpa [#allocation5], 0 }
   0x4   :  { %15 = vsyncpa [#allocation5 + $0x1], 0  ;;  %s1341_s15 = smov 0   ;;  %s1343_s16 = smov 0  }
   0x5   :  { %s1345_s17 = smov 0   ;;  %s1347_s18 = smov 0  }
   0x6 LB: > { %s1362_s19 = sadd.s32 4294967295, %s1303_s18   ;;  %s842_s20 = sadd.s32 4294967294, %s1303_s18   ;;  %s1303_s18 = sphi %s1347_s18, %s1632_s18   ;;  %s1299_s17 = sphi %s1345_s17, %s1631_s17   ;;  %s1295_s16 = sphi %s1343_s16, %s1630_s16   ;;  %s1291_s15 = sphi %s1341_s15, %s1629_s15  }
   0x7   : > { %p41_p0 = scmp.ne.s32.totalorder %s1295_s16, %s1291_s15  ;;  %p1613_p1 = scmp.eq.s32.totalorder %s1362_s19, 0 }
   0x8   : > { %p134_p3 = scmp.eq.s32.totalorder %s842_s20, 7  ;;  %p843_p5 = scmp.ge.s32.totalorder %s1303_s18, 1 }
   0x9   : > { %p1371_p4 = por %p1613_p1, %p41_p0  ;;  %p141_p7 = scmp.lt.s32.totalorder %s1303_s18, 9 }
   0xa   : > { %p1376_p6 = por %p134_p3, %p41_p0  ;;  %s1305_s24 = smov [#allocation6]  }
   0xb   : > { %s1616_s21 = scalar_select %p1371_p4, 1, 0 }
   0xc   : > { %s1617_s22 = scalar_select %p1376_p6, 1, 0 }
   0xd   : > { %p1382_p9 = pnand %p843_p5, %p141_p7  ;;  %s156_s25 = sshll.u32 %s1305_s24, 4  ;;  %s157_s25 = int_to_ptr.vmem [resolvable:$true] %s156_s25 }
   0xe   : > { %s1306_s27 = smov [#allocation8]   ;;  %s1147_s5 = scalar_lea.hbm %s1610_s2, 6912 }
   0xf   : > { %s1618_s23 = scalar_select %p1382_p9, 1, 0 }
  0x10   : > { %p1075_p10 = pneg %p1382_p9  ;;  %s169_s28 = sshll.u32 %s1306_s27, 4  ;;  %s1394_s28 = int_to_ptr.vmem [resolvable:$true] %s169_s28 }
  0x11   : > { %p1148_p12 = scmp.ne.s32.totalorder %s1610_s2, %s1147_s5  ;;  %p1154_p5 = scmp.lt.u32.totalorder %s1147_s5, %s1610_s2 }
  0x12   : > { %p1390_p11 = pnand %p1075_p10, %p1613_p1 }
  0x14   : > { %p1149_p13 = pneg %p1390_p11 }
  0x16   : > { %p1150_p0 = pnand %p1149_p13, %p1148_p12 }
  0x18   : > { %p1151_p3 = pneg %p1150_p0 }
  0x1a   : > { %p1156_p7 = pnand %p1154_p5, %p1151_p3 }
  0x1c   : > { %1159 = shalt.err (!%p1156_p7)
}
  0x1d   : > { %s1160_s10 = scalar_lea.vmem %s157_s25, 6912  ;;  %p1168_p2 = scmp.lt.s32.totalorder %s157_s25, %s157_s25 }
  0x1e   : > { %p1161_p10 = scmp.ne.s32.totalorder %s157_s25, %s1160_s10  ;;  %p1169_p6 = scmp.lt.s32.totalorder %s1160_s10, %s1160_s10 }
  0x20   : > { %p1163_p8 = pnand %p1161_p10, %p1149_p13  ;;  %p1170_p4 = por %p1169_p6, %p1168_p2 }
  0x22   : > { %p1164_p1 = pneg %p1163_p8 }
  0x24   : > { %p1171_p9 = pnand %p1170_p4, %p1164_p1 }
  0x26   : > { %1174 = shalt.err (!%p1171_p9)
}
  0x27   : > { %s1307_s11 = smov 384   ;;  %s1308_s12 = smov 24  }
  0x28   : > { %1078 = dma.hbm_to_vmem [thread:$0]  (!%p1390_p11), %s1610_s2, 6912, %s157_s25, [#allocation7], %s1307_s11, %s1307_s11, %s1308_s12  }
  0x29   : > { %s1175_s27 = scalar_lea.hbm %s1611_s3, 2176 }
  0x2a   : > { %p1176_p8 = scmp.ne.s32.totalorder %s1611_s3, %s1175_s27  ;;  %p1182_p4 = scmp.lt.u32.totalorder %s1175_s27, %s1611_s3 }
  0x2c   : > { %p1178_p1 = pnand %p1176_p8, %p1149_p13 }
  0x2e   : > { %p1179_p2 = pneg %p1178_p1 }
  0x30   : > { %p1184_p6 = pnand %p1182_p4, %p1179_p2 }
  0x32   : > { %1187 = shalt.err (!%p1184_p6)
}
  0x33   : > { %s1188_s25 = scalar_lea.vmem %s1394_s28, 2176  ;;  %p1196_p3 = scmp.lt.s32.totalorder %s1394_s28, %s1394_s28 }
  0x34   : > { %p1189_p9 = scmp.ne.s32.totalorder %s1394_s28, %s1188_s25  ;;  %p1197_p5 = scmp.lt.s32.totalorder %s1188_s25, %s1188_s25 }
  0x36   : > { %p1191_p12 = pnand %p1189_p9, %p1149_p13  ;;  %p1198_p7 = por %p1197_p5, %p1196_p3 }
  0x38   : > { %p1192_p0 = pneg %p1191_p12 }
  0x3a   : > { %p1199_p10 = pnand %p1198_p7, %p1192_p0 }
  0x3c   : > { %1202 = shalt.err (!%p1199_p10)
}
  0x3d   : > { %s1309_s7 = smov 128   ;;  %s1310_s8 = smov 8  }
  0x3e   : > { %1081 = dma.hbm_to_vmem [thread:$0]  (!%p1390_p11), %s1611_s3, 2176, %s1394_s28, [#allocation7], %s1309_s7, %s1309_s7, %s1310_s8  }
  0x3f   : > { %s1444_s11 = sadd.s32 1, %s1303_s18   ;;  %s28_s13 = sadd.s32 1, %s1299_s17 }
  0x40   : > { %s25_s12 = ssub.s32 %s1303_s18, %s1444_s11  ;;  %p35_p8 = scmp.ne.s32.totalorder %s1299_s17, %s1295_s16 }
  0x41   : > { %p26_p13 = scmp.eq.s32.totalorder %s25_s12, 0  ;;  %p36_p1 = scmp.eq.s32.totalorder %s1303_s18, 0 }
  0x42   : > { %p1620_p4 = scmp.eq.s32.totalorder %s1362_s19, 7  ;;  %p1092_p9 = scmp.lt.s32.totalorder %s1303_s18, 8 }
  0x43   : > { %s1453_s14 = scalar_select %p26_p13, %s1299_s17, %s28_s13  }
  0x44   : > { %p37_p2 = por %p36_p1, %p35_p8  ;;  %p1457_p6 = por %p1620_p4, %p35_p8 }
  0x45   : > { %s183_s26 = sand.u32 1, %s1299_s17   ;;  %s848_s28 = sshll.u32 %s1303_s18, 5 }
  0x46   : > { %s847_s24 = sshll.u32 %s183_s26, 1  ;;  %s1467_s30 = scalar_lea.hbm %s1608_s0, %s848_s28 }
  0x47   : > { %s187_s5 = scalar_lea.vmem [#allocation3], %s847_s24  ;;  %p1471_p11 = pnand %p1092_p9, %p37_p2 }
  0x48   : > { %s194_s6 = sshll.u32 %s187_s5, 4  ;;  %s184_s7 = scalar_lea.sflag [#allocation4], %s183_s26  ;;  %s1469_s6 = int_to_ptr.vmem [resolvable:$true] %s194_s6 }
  0x49   : > { %s1203_s8 = scalar_lea.hbm %s1467_s30, 32  ;;  %p1205_p0 = pneg %p1471_p11 }
  0x4a   : > { %p1204_p12 = scmp.ne.s32.totalorder %s1467_s30, %s1203_s8  ;;  %s1208_s12 = scalar_lea.hbm %s1608_s0, 256 }
  0x4b   : > { %p1209_p7 = scmp.lt.u32.totalorder %s1467_s30, %s1608_s0  ;;  %p1210_p10 = scmp.lt.u32.totalorder %s1208_s12, %s1203_s8 }
  0x4c   : > { %p1206_p3 = pnand %p1205_p0, %p1204_p12  ;;  %p1212_p8 = scmp.lt.u32.totalorder %s1203_s8, %s1467_s30 }
  0x4d   : > { %p1211_p13 = por %p1210_p10, %p1209_p7 }
  0x4e   : > { %p1207_p5 = pneg %p1206_p3 }
  0x4f   : > { %p1213_p1 = por %p1212_p8, %p1211_p13 }
  0x51   : > { %p1214_p2 = pnand %p1213_p1, %p1207_p5 }
  0x53   : > { %1217 = shalt.err (!%p1214_p2)
}
  0x54   : > { %s1218_s26 = scalar_lea.vmem %s1469_s6, 32  ;;  %s1311_s28 = smov [#allocation3]  }
  0x55   : > { %p1219_p4 = scmp.ne.s32.totalorder %s1469_s6, %s1218_s26  ;;  %s1223_s27 = sshll.u32 %s1311_s28, 4  ;;  %s1224_s27 = int_to_ptr.vmem [resolvable:$false] %s1223_s27 }
  0x56   : > { %s1225_s29 = scalar_lea.vmem %s1224_s27, 64  ;;  %p1226_p3 = scmp.lt.s32.totalorder %s1469_s6, %s1224_s27 }
  0x57   : > { %p1221_p9 = pnand %p1219_p4, %p1205_p0  ;;  %p1227_p7 = scmp.lt.s32.totalorder %s1225_s29, %s1218_s26 }
  0x59   : > { %p1222_p12 = pneg %p1221_p9  ;;  %p1228_p10 = por %p1227_p7, %p1226_p3 }
  0x5b   : > { %p1229_p13 = pnand %p1228_p10, %p1222_p12 }
  0x5d   : > { %1232 = shalt.err (!%p1229_p13)
}
  0x5e   : > { %1085 = dma.hbm_to_vmem [thread:$0]  (!%p1471_p11), %s1467_s30, 32, %s1469_s6, %s184_s7  }
  0x5f   : > { %p1623_p5 = scmp.ne.s32.totalorder %s1618_s23, 0 }
  0x60   : > { %s1503_s5 = sand.u32 (!%p1623_p5), 1, %s1295_s16   ;;  %p1624_p0 = scmp.ne.s32.totalorder (!%p1623_p5), %s1616_s21, 0 }
  0x61   : > { %203 = sbr.rel (%p1623_p5) target bundleno = 639 (0x27f), region = 36  ;;  %s850_s8 = sshll.u32 (!%p1623_p5), %s1503_s5, 1 }
  0x62   : > { %s206_s9 = scalar_lea.sflag (!%p1623_p5), [#allocation4], %s1503_s5  ;;  %s1507_s10 = scalar_lea.vmem (!%p1623_p5), [#allocation3], %s850_s8 }
  0x68   : > { %1278 = dma.done.wait (%p1624_p0), %s206_s9, 32  }
  0x69   : > { %1280 = vsyncadd (%p1624_p0), %s206_s9, 4294967264  ;;  %p1625_p11 = scmp.eq.s32.totalorder %s1362_s19, 0 }
  0x6b   : > { %1282 = dma.done.wait (%p1625_p11), [#allocation7], 9088   ;;  %p1626_p8 = pmov %p1625_p11 }
  0x6c   : > { %s853_s23 = sshll.u32 %s1503_s5, 2  ;;  %p1627_p1 = scmp.ne.s32.totalorder %s1362_s19, 0 }
  0x6d   : > { %1284 = vsyncadd (%p1626_p8), [#allocation7], 4294958208  ;;  %s1518_s30 = scalar_lea.vmem [#allocation9], %s853_s23  ;;  %v246_v0 = vld [vmem:[%s1609_s1] sm:$0x3] (!%p1627_p1) }
  0x6e   : > { %245 = sbr.rel (%p1627_p1) target bundleno = 117 (0x75), region = 52  ;;  %247 = vst [vmem:[#allocation2] sm:$0x3] (!%p1627_p1), %v246_v0 }
  0x75 PF: > { %v254_v1 = vld [vmem:[#allocation6 + $0x20] sm:$0xff]  ;;  %v257_v2 = vld [vmem:[#allocation6 + $0x38] sm:$0xff]  ;;  %v256_v5 = vld [vmem:[#allocation6 + $0x30] sm:$0xff]  ;;  %v1312_v8 = vmov 0.0   ;;  %vm321_vm0 = vcmask 64512   ;;  %vm1313_vm1 = vmmov 0  }
  0x76   : > { %v253_v3 = vld [vmem:[#allocation6 + $0x18] sm:$0xff]  ;;  %v977_v4 = vpack.c.bf16 %v257_v2, %v254_v1  ;;  %v260_v6 = vld [vmem:[#allocation6 + $0x50] sm:$0xff]  ;;  %v263_v7 = vld [vmem:[#allocation6 + $0x68] sm:$0xff]  ;;  %389 = vmatprep.mubr.f32.mxu1 %v1312_v8  ;;  %546 = vmatprep.mubr.f32.mxu0 %v1312_v8  ;;  %v1314_v34 = vmov 0.0|0.0   ;;  %s865_s21 = sshll.u32 %s1362_s19, 6  ;;  %s753_s7 = sshll.u32 %s1518_s30, 4  ;;  %s1566_s7 = int_to_ptr.vmem [resolvable:$true] %s753_s7 }
  0x77   : > { %v979_v9 = vpack.c.bf16 %v256_v5, %v253_v3  ;;  %v981_v10 = vpack.c.bf16 %v263_v7, %v260_v6  ;;  %v259_v11 = vld [vmem:[#allocation6 + $0x48] sm:$0xff]  ;;  %v262_v12 = vld [vmem:[#allocation6 + $0x60] sm:$0xff]  ;;  %v269_v14 = vld [vmem:[#allocation6 + $0x98] sm:$0xff]  ;;  %s1564_s24 = scalar_lea.hbm %s1612_s4, %s865_s21  ;;  %s739_s26 = scalar_lea.sflag [#allocation5], %s1503_s5 }
  0x78   : > { %v266_v13 = vld [vmem:[#allocation6 + $0x80] sm:$0xff]  ;;  %978 = vmatprep.subr.bf16.mxu0 %v977_v4  ;;  %v983_v15 = vpack.c.bf16 %v262_v12, %v259_v11  ;;  %v265_v17 = vld [vmem:[#allocation6 + $0x78] sm:$0xff]  ;;  %v268_v18 = vld [vmem:[#allocation6 + $0x90] sm:$0xff]  ;;  %s1233_s28 = scalar_lea.vmem %s1566_s7, 64  ;;  %s1315_s19 = smov [#allocation9]  }
  0x79   : > { %980 = vmatpush1.bf16.msra.mxu0 %v979_v9  ;;  %v985_v16 = vpack.c.bf16 %v269_v14, %v266_v13  ;;  %v272_v19 = vld [vmem:[#allocation6 + $0xb0] sm:$0xff]  ;;  %v275_v20 = vld [vmem:[#allocation6 + $0xc8] sm:$0xff]  ;;  %v250_v22 = vld [vmem:[#allocation6] sm:$0xff]  ;;  %v987_v23 = vpack.c.bf16 %v268_v18, %v265_v17  ;;  %p1234_p2 = scmp.ne.s32.totalorder %s1566_s7, %s1233_s28  ;;  %s1237_s27 = sshll.u32 %s1315_s19, 4  ;;  %s1238_s27 = int_to_ptr.vmem [resolvable:$false] %s1237_s27 }
  0x7a   : > { %982 = vmatprep.subr.bf16.mxu0 %v981_v10  ;;  %v251_v21 = vld [vmem:[#allocation6 + $0x8] sm:$0xff]  ;;  %v248_v24 = vld [vmem:[%s1507_s10] sm:$0x3]  ;;  %v989_v25 = vpack.c.bf16 %v275_v20, %v272_v19  ;;  %v274_v27 = vld [vmem:[#allocation6 + $0xc0] sm:$0xff]  ;;  %s1239_s29 = scalar_lea.vmem %s1238_s27, 128  ;;  %p1240_p12 = scmp.lt.s32.totalorder %s1566_s7, %s1238_s27 }
  0x7b   : > { %325 = vmatprep.subr.mxu1 %v251_v21  ;;  %v271_v26 = vld [vmem:[#allocation6 + $0xa8] sm:$0xff]  ;;  %v252_v28 = vld [vmem:[#allocation6 + $0x10] sm:$0xff]  ;;  %v278_v29 = vld [vmem:[#allocation6 + $0xe0] sm:$0xff]  ;;  %p1235_p4 = pnand %p1234_p2, %p1457_p6  ;;  %p1241_p3 = scmp.lt.s32.totalorder %s1239_s29, %s1233_s28 }
  0x7c   : > { %326 = vmatpush1.msra.mxu1 %v250_v22  ;;  %v281_v30 = vld [vmem:[#allocation6 + $0xf8] sm:$0xff]  ;;  %v255_v31 = vld [vmem:[#allocation6 + $0x28] sm:$0xff]  ;;  %v258_v32 = vld [vmem:[#allocation6 + $0x40] sm:$0xff]  ;;  %v991_v33 = vpack.c.bf16 %v274_v27, %v271_v26 }
  0x7d   : > { %984 = vmatpush1.bf16.msra.mxu0 %v983_v15  ;;  %855 = vmatmul.mubr.msk.f32.vlgmr.msra.gmra.mrb[0].mxu1 %vm321_vm0, %v248_v24  ;;  %v1010_v35 = vpack.c.bf16 %v258_v32, %v255_v31  ;;  %v261_v36 = vld [vmem:[#allocation6 + $0x58] sm:$0xff]  ;;  %v993_v37 = vpack.c.bf16 %v281_v30, %v278_v29  ;;  %v280_v39 = vld [vmem:[#allocation6 + $0xf0] sm:$0xff]  ;;  %v287_v42 = vld [vmem:[#allocation6 + $0x128] sm:$0xff]  ;;  %p1236_p9 = pneg %p1235_p4  ;;  %p1242_p7 = por %p1241_p3, %p1240_p12 }
  0x7e   : > { %986 = vmatprep.subr.bf16.mxu0 %v985_v16  ;;  %902 = vmatprep.subr.mxu1 %v1312_v8  ;;  %v277_v38 = vld [vmem:[#allocation6 + $0xd8] sm:$0xff]  ;;  %v264_v40 = vld [vmem:[#allocation6 + $0x70] sm:$0xff]  ;;  %v267_v44 = vld [vmem:[#allocation6 + $0x88] sm:$0xff] }
  0x7f   : > { %904 = vmatprep.mubr.msk.f32.mxu1 %vm1313_vm1, %v1312_v8  ;;  %903 = vmatpush3.msra.mxu1 %v252_v28  ;;  %v284_v41 = vld [vmem:[#allocation6 + $0x110] sm:$0xff]  ;;  %v1013_v43 = vpack.c.bf16 %v264_v40, %v261_v36  ;;  %v270_v45 = vld [vmem:[#allocation6 + $0xa0] sm:$0xff]  ;;  %v995_v46 = vpack.c.bf16 %v280_v39, %v277_v38  ;;  %v283_v48 = vld [vmem:[#allocation6 + $0x108] sm:$0xff]  ;;  %p1243_p10 = pnand %p1242_p7, %p1236_p9 }
  0x80   : > { %1009 = vmatprep.subr.bf16.mxu1 %v1314_v34  ;;  %v997_v47 = vpack.c.bf16 %v287_v42, %v284_v41  ;;  %v286_v49 = vld [vmem:[#allocation6 + $0x120] sm:$0xff]  ;;  %v293_v51 = vld [vmem:[#allocation6 + $0x158] sm:$0xff]  ;;  %v1016_v52 = vpack.c.bf16 %v270_v45, %v267_v44  ;;  %v276_v54 = vld [vmem:[#allocation6 + $0xd0] sm:$0xff]  ;;  %v306_v44 = vlaneseq }
  0x81   : > { %988 = vmatpush1.bf16.msra.mxu0 %v987_v23  ;;  %905 = vmatmul.mubr.msk.f32.vlgmr.msra.gmra.mrb[2].mxu1 %vm321_vm0, %v248_v24  ;;  %v290_v50 = vld [vmem:[#allocation6 + $0x140] sm:$0xff]  ;;  %v273_v53 = vld [vmem:[#allocation6 + $0xb8] sm:$0xff]  ;;  %v999_v55 = vpack.c.bf16 %v286_v49, %v283_v48  ;;  %v292_v58 = vld [vmem:[#allocation6 + $0x150] sm:$0xff] }
  0x82   : > { %990 = vmatprep.subr.bf16.mxu0 %v989_v25  ;;  %1011 = vmatpush3.bf16.msra.mxu1 %v1010_v35  ;;  %v1001_v56 = vpack.c.bf16 %v293_v51, %v290_v50  ;;  %v289_v57 = vld [vmem:[#allocation6 + $0x138] sm:$0xff]  ;;  %v296_v59 = vld [vmem:[#allocation6 + $0x170] sm:$0xff]  ;;  %v299_v60 = vld [vmem:[#allocation6 + $0x188] sm:$0xff]  ;;  %v1019_v61 = vpack.c.bf16 %v276_v54, %v273_v53 }
  0x83   : > { %939 = vmatprep.mubr.msk.f32.mxu1 %vm1313_vm1, %v1312_v8  ;;  %1012 = vmatprep.subr.bf16.mxu1 %v1314_v34  ;;  %v279_v62 = vld [vmem:[#allocation6 + $0xe8] sm:$0xff]  ;;  %v282_v63 = vld [vmem:[#allocation6 + $0x100] sm:$0xff]  ;;  %v1003_v0 = vpack.c.bf16 %v292_v58, %v289_v57  ;;  %v1005_v1 = vpack.c.bf16 %v299_v60, %v296_v59  ;;  %v285_v5 = vld [vmem:[#allocation6 + $0x118] sm:$0xff] }
  0x84   : > { %v295_v2 = vld [vmem:[#allocation6 + $0x168] sm:$0xff]  ;;  %v298_v3 = vld [vmem:[#allocation6 + $0x180] sm:$0xff]  ;;  %v1022_v4 = vpack.c.bf16 %v282_v63, %v279_v62  ;;  %v288_v6 = vld [vmem:[#allocation6 + $0x130] sm:$0xff] }
  0x85   : > { %992 = vmatpush1.bf16.msra.mxu0 %v991_v33  ;;  %v1007_v7 = vpack.c.bf16 %v298_v3, %v295_v2  ;;  %v1025_v9 = vpack.c.bf16 %v288_v6, %v285_v5  ;;  %v291_v10 = vld [vmem:[#allocation6 + $0x148] sm:$0xff]  ;;  %v294_v11 = vld [vmem:[#allocation6 + $0x160] sm:$0xff]  ;;  %v1541_v12 = vld [vmem:[#allocation2] sm:$0x3] }
  0x86   : > { %994 = vmatprep.subr.bf16.mxu0 %v993_v37  ;;  %1014 = vmatpush3.bf16.msra.mxu1 %v1013_v43  ;;  %v1028_v13 = vpack.c.bf16 %v294_v11, %v291_v10  ;;  %v297_v14 = vld [vmem:[#allocation6 + $0x178] sm:$0xff]  ;;  %v300_v15 = vld [vmem:[#allocation6 + $0x190] sm:$0xff]  ;;  %v647_v20 = vld [vmem:[#allocation8 + $0x10] sm:$0xff] }
  0x87   : > { %1015 = vmatprep.subr.bf16.mxu1 %v1314_v34  ;;  %v1031_v16 = vpack.c.bf16 %v300_v15, %v297_v14  ;;  %v645_v17 = vld [vmem:[#allocation8] sm:$0xff]  ;;  %v646_v18 = vld [vmem:[#allocation8 + $0x8] sm:$0xff]  ;;  %v648_v21 = vld [vmem:[#allocation8 + $0x18] sm:$0xff] }
  0x88   : > { %v1034_v19 = vpack.c.bf16 %v646_v18, %v645_v17  ;;  %v1037_v22 = vpack.c.bf16 %v648_v21, %v647_v20  ;;  %v650_v23 = vld [vmem:[#allocation8 + $0x28] sm:$0xff]  ;;  %v651_v25 = vld [vmem:[#allocation8 + $0x30] sm:$0xff]  ;;  %v652_v26 = vld [vmem:[#allocation8 + $0x38] sm:$0xff] }
  0x89   : > { %996 = vmatpush1.bf16.msra.mxu0 %v995_v46  ;;  %v1043_v27 = vpack.c.bf16 %v652_v26, %v651_v25  ;;  %v653_v28 = vld [vmem:[#allocation8 + $0x40] sm:$0xff]  ;;  %v654_v29 = vld [vmem:[#allocation8 + $0x48] sm:$0xff]  ;;  %v655_v31 = vld [vmem:[#allocation8 + $0x50] sm:$0xff]  ;;  %v307_v46 = vshrl.u32 %v306_v44, 7 }
  0x8a   : > { %998 = vmatprep.subr.bf16.mxu0 %v997_v47  ;;  %1017 = vmatpush3.bf16.msra.mxu1 %v1016_v52  ;;  %v1046_v30 = vpack.c.bf16 %v654_v29, %v653_v28  ;;  %v656_v32 = vld [vmem:[#allocation8 + $0x58] sm:$0xff]  ;;  %v657_v35 = vld [vmem:[#allocation8 + $0x60] sm:$0xff]  ;;  %v658_v36 = vld [vmem:[#allocation8 + $0x68] sm:$0xff] }
  0x8b   : > { %1018 = vmatprep.subr.bf16.mxu1 %v1314_v34  ;;  %v1049_v33 = vpack.c.bf16 %v656_v32, %v655_v31  ;;  %v1052_v37 = vpack.c.bf16 %v658_v36, %v657_v35  ;;  %v659_v38 = vld [vmem:[#allocation8 + $0x70] sm:$0xff]  ;;  %v660_v39 = vld [vmem:[#allocation8 + $0x78] sm:$0xff]  ;;  %v308_v47 = vsub.s32 0, %v307_v46  ;;  %v312_v49 = vsub.s32 1, %v307_v46 }
  0x8c   : > { %v1055_v40 = vpack.c.bf16 %v660_v39, %v659_v38  ;;  %v302_v48 = vld [vmem:[#allocation6 + $0x198] ss:$8 sm:$0x7]  ;;  %v304_v52 = vld [vmem:[#allocation6 + $0x199] ss:$8 sm:$0x7] }
  0x8d   : > { %1000 = vmatpush1.bf16.msra.mxu0 %v999_v55  ;;  %v309_v50 = vrot.slane %v302_v48, %v308_v47  ;;  %v313_v51 = vrot.slane %v302_v48, %v312_v49  ;;  %v470_v54 = vrot.slane %v304_v52, %v308_v47 }
  0x8e   : > { %1002 = vmatprep.subr.bf16.mxu0 %v1001_v56  ;;  %1020 = vmatpush3.bf16.msra.mxu1 %v1019_v61  ;;  %v474_v56 = vrot.slane %v304_v52, %v312_v49 }
  0x8f   : > { %1021 = vmatprep.subr.bf16.mxu1 %v1314_v34 }
  0x91   : > { %1004 = vmatpush1.bf16.msra.mxu0 %v1003_v0 }
  0x92   : > { %1006 = vmatprep.subr.bf16.mxu0 %v1005_v1  ;;  %1023 = vmatpush3.bf16.msra.mxu1 %v1022_v4  ;;  %v316_v4 = vsub.s32 2, %v307_v46 }
  0x93   : > { %1024 = vmatprep.subr.bf16.mxu1 %v1314_v34 }
  0x94   : > { %v478_v5 = vrot.slane %v304_v52, %v316_v4 }
  0x95   : > { %1008 = vmatpush1.bf16.msra.mxu0 %v1007_v7  ;;  %v317_v7 = vrot.slane %v302_v48, %v316_v4 }
  0x96   : > { %1033 = vmatprep.subr.bf16.mxu0 %v1314_v34  ;;  %1026 = vmatpush3.bf16.msra.mxu1 %v1025_v9 }
  0x97   : > { %1027 = vmatprep.subr.bf16.mxu1 %v1314_v34 }
  0x98   : > { %547 = vmatmul.mubr.f32.vlgmr.msra.gmra.mrb[0].mxu0 %v1541_v12 }
  0x99   : > { %974 = vmatprep.mubr.msk.f32.mxu0 %vm1313_vm1, %v1312_v8  ;;  %1035 = vmatpush3.bf16.msra.mxu0 %v1034_v19  ;;  %v649_v8 = vld [vmem:[#allocation8 + $0x20] sm:$0xff] }
  0x9a   : > { %1029 = vmatpush3.bf16.msra.mxu1 %v1028_v13  ;;  %1036 = vmatprep.subr.bf16.mxu0 %v1314_v34  ;;  %v1040_v24 = vpack.c.bf16 %v650_v23, %v649_v8 }
  0x9b   : > { %1030 = vmatprep.subr.bf16.mxu1 %v1314_v34 }
  0x9d   : > { %1038 = vmatpush3.bf16.msra.mxu0 %v1037_v22  ;;  %v859_v22 = vld [vmem:[#allocation8 + $0x80] ss:$0 sm:$0xff] }
  0x9e   : > { %1032 = vmatpush3.bf16.msra.mxu1 %v1031_v16  ;;  %1039 = vmatprep.subr.bf16.mxu0 %v1314_v34 }
  0xa1   : > { %940 = vmatmul.mubr.f32.vlgmr.msra.gmra.mrb[4].mxu1 %v1541_v12  ;;  %1041 = vmatpush3.bf16.msra.mxu0 %v1040_v24 }
  0xa2   : > { %1042 = vmatprep.subr.bf16.mxu0 %v1314_v34 }
  0xa5   : > { %1044 = vmatpush3.bf16.msra.mxu0 %v1043_v27 }
  0xa6   : > { %1045 = vmatprep.subr.bf16.mxu0 %v1314_v34 }
  0xa9   : > { %1047 = vmatpush3.bf16.msra.mxu0 %v1046_v30 }
  0xaa   : > { %1048 = vmatprep.subr.bf16.mxu0 %v1314_v34 }
  0xad   : > { %1050 = vmatpush3.bf16.msra.mxu0 %v1049_v33 }
  0xae   : > { %1051 = vmatprep.subr.bf16.mxu0 %v1314_v34 }
  0xb1   : > { %1053 = vmatpush3.bf16.msra.mxu0 %v1052_v37 }
  0xb2   : > { %1054 = vmatprep.subr.bf16.mxu0 %v1314_v34 }
  0xb5   : > { %1056 = vmatpush3.bf16.msra.mxu0 %v1055_v40 }
 0x150   : > { %v391_v41 = vpop.f32.mrb[0].mxu1 }
 0x151   : > { %v393_v42 = vpop.f32.mrb[1].mxu1  ;;  %v392_v53 = vadd.f32 %v391_v41, %v309_v50 }
 0x152   : > { %v394_v55 = vadd.f32 %v393_v42, %v313_v51 }
 0x153   : > { %v1058_v57 = vadd.f32 %v470_v54, %v392_v53 }
 0x154   : > { %v462_v43 = vpop.f32.mrb[2].mxu1  ;;  %v1061_v34 = vadd.f32 %v474_v56, %v394_v55 }
 0x155   : > { %v906_v45 = vpop.f32.mrb[3].mxu1  ;;  %v463_v13 = vadd.f32 %v462_v43, %v317_v7 }
 0x16b   : > { %v548_v58 = vpop.f32.mrb[0].mxu0 }
 0x16c   : > { %v1059_v59 = vadd.f32 %v1058_v57, %v548_v58  ;;  %v550_v60 = vpop.f32.mrb[1].mxu0 }
 0x16d   : > { %v1062_v61 = vadd.f32 %v1061_v34, %v550_v60 }
 0x16e   : > { %v857_v62 = vmul.f32 -1.442695, %v1059_v59 }
 0x16f   : > { %v858_v63 = vmul.f32 -1.442695, %v1062_v61 }
 0x170   : > { %1137 = vpow2.f32 %v857_v62 }
 0x171   : > { %1139 = vpow2.f32 %v858_v63 }
 0x174   : > { %v619_v0 = vpop.f32.mrb[4].mxu1 }
 0x175   : > { %v941_v1 = vpop.f32.mrb[5].mxu1  ;;  %v620_v10 = vadd.f32 %v619_v0, %v478_v5 }
 0x17a   : > { %v1138_v2 = vpop.eup %1137 }
 0x17b   : > { %v627_v3 = vadd.f32 1.0, %v1138_v2  ;;  %v1140_v6 = vpop.eup %1139 }
 0x17c   : > { %v634_v9 = vadd.f32 1.0, %v1140_v6 }
 0x17d   : > { %1141 = vrcp.f32 %v627_v3 }
 0x17e   : > { %1143 = vrcp.f32 %v634_v9 }
 0x187   : > { %v1142_v11 = vpop.eup %1141 }
 0x188   : > { %v637_v14 = vmul.f32 %v1142_v11, %v620_v10  ;;  %v1144_v16 = vpop.eup %1143 }
 0x189   : > { %v640_v17 = vsub.f32 1.0, %v1144_v16  ;;  %v642_v20 = vmul.f32 %v1144_v16, %v1541_v12 }
 0x18a   : > { %v638_v15 = vadd.f32 %v637_v14, %v463_v13 }
 0x18c   : > { %1145 = vtanh.f32 %v638_v15 }
 0x196   : > { %v1146_v18 = vpop.eup %1145 }
 0x197   : > { %v641_v19 = vmul.f32 %v1146_v18, %v640_v17 }
 0x199   : > { %v643_v21 = vadd.f32 %v642_v20, %v641_v19 }
 0x19b   : > { %644 = vst [vmem:[#allocation2] sm:$0x3] %v643_v21  ;;  %975 = vmatmul.mubr.f32.vlgmr.msra.gmra.mrb[2].mxu0 %v643_v21  ;;  %736 = vst [vmem:[%s1518_s30] sm:$0x3] %v643_v21 }
 0x26e   : > { %v732_v8 = vpop.f32.mrb[2].mxu0 }
 0x26f   : > { %v733_v23 = vadd.f32 %v859_v22, %v732_v8  ;;  %v976_v24 = vpop.f32.mrb[3].mxu0 }
 0x271   : > { %737 = vst [vmem:[%s1518_s30 + $0x2] sm:$0x3] %v733_v23 }
 0x272   : > { %1246 = shalt.err (!%p1243_p10)
}
 0x273   : > { %s1247_s5 = scalar_lea.hbm %s1564_s24, 64  ;;  %s1251_s10 = scalar_lea.hbm %s1612_s4, 512 }
 0x274   : > { %p1248_p13 = scmp.ne.s32.totalorder %s1564_s24, %s1247_s5  ;;  %p1252_p11 = scmp.lt.u32.totalorder %s1564_s24, %s1612_s4 }
 0x275   : > { %p1253_p8 = scmp.lt.u32.totalorder %s1251_s10, %s1247_s5  ;;  %p1255_p2 = scmp.lt.u32.totalorder %s1247_s5, %s1564_s24 }
 0x276   : > { %p1249_p5 = pnand %p1248_p13, %p1457_p6 }
 0x277   : > { %p1254_p1 = por %p1253_p8, %p1252_p11 }
 0x278   : > { %p1250_p0 = pneg %p1249_p5 }
 0x279   : > { %p1256_p4 = por %p1255_p2, %p1254_p1 }
 0x27b   : > { %p1257_p9 = pnand %p1256_p4, %p1250_p0 }
 0x27d   : > { %1260 = shalt.err (!%p1257_p9)
}
 0x27e   : > { %1073 = dma.vmem_to_hbm [thread:$0]  (%p1457_p6), %s1566_s7, 64, %s1564_s24, %s739_s26  }
 0x27f PF: > { %p1095_p12 = scmp.ge.s32.totalorder %s1303_s18, 2  ;;  %s765_s6 = sand.u32 1, %s1291_s15  }
 0x280   : > { %p1628_p3 = scmp.ne.s32.totalorder %s1617_s22, 0  ;;  %s766_s25 = scalar_lea.sflag [#allocation5], %s765_s6 }
 0x282   : > { %p1087_p7 = pnand %p1095_p12, %p1628_p3 }
 0x284   : > { %1286 = dma.done.wait (!%p1087_p7), %s766_s25, 64  }
 0x285   : > { %1288 = vsyncadd (!%p1087_p7), %s766_s25, 4294967232  ;;  %p18_p10 = scmp.ge.s32.totalorder %s1444_s11, 10   ;;  %s1629_s15 = smov %s1295_s16 }
 0x286   : > { %s1630_s16 = smov %s1299_s17  ;;  %s1631_s17 = smov %s1453_s14 }
 0x287   : > { %s1632_s18 = smov %s1444_s11  ;;  %20 = sbr.rel (!%p18_p10) target bundleno = 6 (0x6), region = 95 }
 0x28e   :  { %771 = vsyncpa [#allocation4], 1 }
 0x28f   :  { %773 = vsyncpa [#allocation4 + $0x1], 1 }
 0x290   :  { %774 = vsyncpa [#allocation7], 1 }
 0x291   :  { %775 = vsyncpa [#allocation5], 1 }
 0x292   :  { %777 = vsyncpa [#allocation5 + $0x1], 1 }

</bundles_post_ra>
